<compile_context>
chip_gen: v6e
topology: v6e:2x2x1
jax: 0.10.0
libtpu: 0.0.40
codegen_flags: <defaults>
</compile_context>

<pallas_src>
import functools

import jax
import jax.numpy as jnp
import numpy as np
from jax.experimental import pallas as pl
from jax.experimental.pallas import tpu as pltpu

BN_EPS = 1e-5
# Plain Python float (NOT a jnp scalar): referenced inside the kernel it
# lowers to a literal, avoiding the "captures constants" trace error.
NEG_FILL = -3.0e38


def _vointmlp_kernel(x_ref, m_ref,
                     w1_ref, t1_ref, w2_ref, t2_ref, w3_ref, t3_ref,
                     wc_ref, tc_ref, o_ref, *, b_blk, n_points, n_views,
                     out_lanes):
    P, V = n_points, n_views

    def layer(h, w_ref, t_ref):
        # 1x1 conv over channels (+ folded conv-bias/BatchNorm) + ReLU.
        y = jnp.dot(w_ref[...], h, preferred_element_type=jnp.float32)
        return jnp.maximum(y + t_ref[...], 0.0)              # f32 epilogue

    slabs = []
    for b in range(b_blk):                                   # static unroll
        x = x_ref[b]                                         # [Cin, N] views-major
        m = m_ref[b]                                         # [1,  N] f32 {0,1}
        dt = x.dtype
        # All per-layer reset_voint_mask multiplies dropped (exact for binary
        # masks): invalid columns never feed valid ones, and the masked
        # view-max below excludes them.
        h = layer(x, w1_ref, t1_ref).astype(dt)
        h = layer(h, w2_ref, t2_ref).astype(dt)
        h = layer(h, w3_ref, t3_ref).astype(dt)
        h = layer(h, wc_ref, tc_ref)                         # classifier, f32
        # vointmax: exclude invalid columns, max over views.  Views-major
        # layout -> V-1 lane-contiguous slice maxima (pure VPU, no relayout).
        hm = jnp.where(m > 0.0, h, NEG_FILL)                 # [Cout, V*P] f32
        red = hm[:, 0:P]
        for v in range(1, V):
            red = jnp.maximum(red, hm[:, v * P:(v + 1) * P])
        # reset_voint_empty: empty points reduce to NEG_FILL; valid maxima are
        # post-ReLU >= 0, so clamping at 0 is exact.
        slabs.append(jnp.maximum(red, 0.0))                  # [Cout, P]
    slab = slabs[0] if b_blk == 1 else jnp.concatenate(slabs, axis=-1)
    pad = out_lanes - b_blk * P
    if pad:
        slab = jnp.concatenate(
            [slab, jnp.zeros((slab.shape[0], pad), jnp.float32)], axis=-1)
    o_ref[0] = slab                                          # lane-dense store


def fold_params(raw_params, compute_dtype=jnp.bfloat16):
    """Fold conv bias + eval-mode BatchNorm into (W', t') per layer.

    raw layer = (W [Cout,Cin], b [Cout] or None, gamma, beta, mean, var).
    W' is emitted in compute_dtype (bf16 MXU operands by default); the
    additive shift t' stays f32 (applied in the f32 epilogue)."""
    folded = []
    for (w, b, gamma, beta, mean, var) in raw_params:
        scale = gamma / jnp.sqrt(var + BN_EPS)                  # [Cout]
        w_f = (w * scale[:, None]).astype(compute_dtype)        # [Cout, Cin]
        b0 = b if b is not None else jnp.zeros_like(mean)
        t_f = ((scale * (b0 - mean) + beta)[:, None]).astype(jnp.float32)
        folded += [w_f, t_f]
    return folded


def vointmlp_forward(voints_feats, voints_mask, raw_params, *,
                     compute_dtype=jnp.bfloat16, lane_target=2048):
    """voints_feats: [bs, Cin, P, V] (PyTorch NCHW); voints_mask: [bs, P, V].

    Returns [bs, out_size, P] (same layout as VointMLP.forward)."""
    bs, cin, P, V = voints_feats.shape
    N = V * P

    # Views-major flatten (N = V*P): one cheap wrapper transpose so the
    # in-kernel view-max is slice-wise over lane-contiguous blocks.
    x = jnp.swapaxes(voints_feats, 2, 3).reshape(bs, cin, N).astype(compute_dtype)
    m = jnp.swapaxes(voints_mask, 1, 2).reshape(bs, 1, N).astype(jnp.float32)

    params = fold_params(raw_params, compute_dtype=compute_dtype)
    cout = params[-2].shape[0]

    # Batch blocking: amortize the per-grid-step overhead, but keep >= 2
    # parallel steps when bs >= 2 so both v7x TensorCores get work.
    b_blk = max(1, min(bs, lane_target // max(N, 1)))
    if bs >= 2:
        b_blk = min(b_blk, max(1, bs // 2))
    num_steps = -(-bs // b_blk)
    bs_pad = num_steps * b_blk
    if bs_pad != bs:
        x = jnp.pad(x, ((0, bs_pad - bs), (0, 0), (0, 0)))
        m = jnp.pad(m, ((0, bs_pad - bs), (0, 0), (0, 0)))

    # Lane-dense output slab width (padded up to a multiple of 128 lanes).
    out_lanes = -(-(b_blk * P) // 128) * 128

    # Rough per-step VMEM footprint; raise the scoped limit only when needed.
    # TODO(synk): for very large P*V add a second grid axis tiling N in
    # multiples of 128*P (views-major) sized to ~half of VMEM (64 MiB on v7x,
    # 128 MiB on v5e/v6e) instead of raising the limit further.
    max_c = max([cin] + [params[2 * i].shape[0] for i in range(4)])
    itemsize = jnp.dtype(compute_dtype).itemsize
    vmem_need = (2 * b_blk * N * (cin * itemsize + 4)      # x + mask, dbl-buffered
                 + 2 * cout * out_lanes * 4                # output, dbl-buffered
                 + 4 * b_blk * N * max_c * 4)              # live intermediates
    vmem_limit = None
    if vmem_need > 24 * 1024 * 1024:
        vmem_limit = min(56 * 1024 * 1024, 2 * vmem_need)

    def full_spec(a):
        nd = a.ndim
        return pl.BlockSpec(a.shape, lambda s, _nd=nd: (0,) * _nd)

    kernel = functools.partial(_vointmlp_kernel, b_blk=b_blk, n_points=P,
                               n_views=V, out_lanes=out_lanes)
    # NOTE: the 8 weight/shift operands keep separate full-array specs (their
    # index_map is constant so they stay VMEM-resident across steps); packing
    # them into one blob only pays off without batch blocking.
    out = pl.pallas_call(
        kernel,
        out_shape=jax.ShapeDtypeStruct((num_steps, cout, out_lanes),
                                       jnp.float32),
        grid_spec=pltpu.PrefetchScalarGridSpec(
            num_scalar_prefetch=0,
            grid=(num_steps,),
            in_specs=[pl.BlockSpec((b_blk, cin, N), lambda s: (s, 0, 0)),
                      pl.BlockSpec((b_blk, 1, N), lambda s: (s, 0, 0))]
                     + [full_spec(p) for p in params],
            out_specs=pl.BlockSpec((1, cout, out_lanes), lambda s: (s, 0, 0)),
        ),
        compiler_params=pltpu.CompilerParams(
            dimension_semantics=("parallel",),
            vmem_limit_bytes=vmem_limit),
    )(x, m, *params)

    # Unpack the lane-packed slabs back to the PyTorch layout [bs, cout, P].
    out = out[:, :, :b_blk * P].reshape(num_steps, cout, b_blk, P)
    out = jnp.transpose(out, (0, 2, 1, 3)).reshape(bs_pad, cout, P)
    return out[:bs]


def init_raw_params(key, in_size, feat_dim, out_size):
    """Deterministic synthetic module parameters (conv W/b + BN stats)."""
    channels = [(in_size, feat_dim, True), (feat_dim, feat_dim, True),
                (feat_dim, feat_dim, True), (feat_dim, out_size, False)]
    raw = []
    keys = jax.random.split(key, 6 * len(channels))
    ki = 0
    for cin, cout, has_bias in channels:
        w = jax.random.normal(keys[ki], (cout, cin), jnp.float32) / np.sqrt(cin); ki += 1
        b = (0.1 * jax.random.normal(keys[ki], (cout,), jnp.float32)
             if has_bias else None); ki += 1
        gamma = 1.0 + 0.1 * jax.random.normal(keys[ki], (cout,), jnp.float32); ki += 1
        beta = 0.1 * jax.random.normal(keys[ki], (cout,), jnp.float32); ki += 1
        mean = 0.05 * jax.random.normal(keys[ki], (cout,), jnp.float32); ki += 1
        var = 1.0 + 0.1 * jnp.abs(jax.random.normal(keys[ki], (cout,), jnp.float32)); ki += 1
        raw.append((w, b, gamma, beta, mean, var))
    return raw


def reference_forward(voints_feats, voints_mask, raw_params):
    """Pure-JAX f32 reference with the original (unfused, 3-mask) semantics."""
    m = voints_mask[:, None, :, :].astype(jnp.float32)
    h = voints_feats.astype(jnp.float32)
    for (w, b, gamma, beta, mean, var) in raw_params:
        y = jnp.einsum('oc,bcpv->bopv', w, h)
        if b is not None:
            y = y + b[None, :, None, None]
        y = y * m                                               # reset_voint_mask
        scale = gamma / jnp.sqrt(var + BN_EPS)
        y = ((y - mean[None, :, None, None]) * scale[None, :, None, None]
             + beta[None, :, None, None])                       # BatchNorm (eval)
        y = y * m
        y = jnp.maximum(y, 0.0)                                  # ReLU
        y = y * m
        h = y
    pen = 1e10 * (1.0 - m)                                       # vointmax penalty
    out = jnp.max(h - pen, axis=-1)                              # [bs, Cout, P]
    empty = (jnp.sum(voints_mask, axis=-1) == 0.0)[:, None, :]   # reset_voint_empty
    return jnp.where(empty, 0.0, out)


if __name__ == "__main__":
    bs, in_size, feat_dim, out_size = 2, 8, 32, 16
    nb_voints, nb_views = 16, 8

    key = jax.random.PRNGKey(0)
    kx, km, kp = jax.random.split(key, 3)

    voints_feats = jax.random.normal(kx, (bs, in_size, nb_voints, nb_views),
                                     jnp.float32)
    voints_mask = (jax.random.uniform(km, (bs, nb_voints, nb_views)) < 0.7
                   ).astype(jnp.float32)
    # make one point fully empty to exercise reset_voint_empty
    voints_mask = voints_mask.at[0, 3, :].set(0.0)

    raw_params = init_raw_params(kp, in_size, feat_dim, out_size)

    out = vointmlp_forward(voints_feats, voints_mask, raw_params)
    out = jax.block_until_ready(out)

    ref = reference_forward(voints_feats, voints_mask, raw_params)
    assert out.shape == (bs, out_size, nb_voints)
    # bf16 MXU operands (f32 accumulation, f32 epilogue) -> bf16-level
    # tolerance vs the pure-f32 reference.  compute_dtype=jnp.float32 gives
    # 1e-3 parity if exactness is required.
    np.testing.assert_allclose(np.asarray(out), np.asarray(ref),
                               rtol=3e-2, atol=3e-2)

    print("KERNEL_OK")
</pallas_src>

<mosaic_0001>
module attributes {stable_mosaic.version = 11 : i64} {
  func.func @_vointmlp_kernel(%arg0: i32, %arg1: memref<1x8x128xbf16, #tpu.memory_space<vmem>>, %arg2: memref<1x1x128xf32, #tpu.memory_space<vmem>>, %arg3: memref<32x8xbf16, #tpu.memory_space<vmem>>, %arg4: memref<32x1xf32, #tpu.memory_space<vmem>>, %arg5: memref<32x32xbf16, #tpu.memory_space<vmem>>, %arg6: memref<32x1xf32, #tpu.memory_space<vmem>>, %arg7: memref<32x32xbf16, #tpu.memory_space<vmem>>, %arg8: memref<32x1xf32, #tpu.memory_space<vmem>>, %arg9: memref<16x32xbf16, #tpu.memory_space<vmem>>, %arg10: memref<16x1xf32, #tpu.memory_space<vmem>>, %arg11: memref<1x16x128xf32, #tpu.memory_space<vmem>>) attributes {dimension_semantics = [#tpu.dimension_semantics<parallel>], iteration_bounds = array<i64: 2>, scalar_prefetch = 0 : i64, scratch_operands = 0 : i64, tpu.core_type = #tpu.core_type<tc>, window_params = [{transform_indices = @transform_0, window_bounds = array<i64: 1, 8, 128>}, {transform_indices = @transform_1, window_bounds = array<i64: 1, 1, 128>}, {pipeline_mode = #tpu.pipeline_mode<synchronous>, transform_indices = @transform_2, window_bounds = array<i64: 32, 8>}, {pipeline_mode = #tpu.pipeline_mode<synchronous>, transform_indices = @transform_3, window_bounds = array<i64: 32, 1>}, {pipeline_mode = #tpu.pipeline_mode<synchronous>, transform_indices = @transform_4, window_bounds = array<i64: 32, 32>}, {pipeline_mode = #tpu.pipeline_mode<synchronous>, transform_indices = @transform_5, window_bounds = array<i64: 32, 1>}, {pipeline_mode = #tpu.pipeline_mode<synchronous>, transform_indices = @transform_6, window_bounds = array<i64: 32, 32>}, {pipeline_mode = #tpu.pipeline_mode<synchronous>, transform_indices = @transform_7, window_bounds = array<i64: 32, 1>}, {pipeline_mode = #tpu.pipeline_mode<synchronous>, transform_indices = @transform_8, window_bounds = array<i64: 16, 32>}, {pipeline_mode = #tpu.pipeline_mode<synchronous>, transform_indices = @transform_9, window_bounds = array<i64: 16, 1>}, {transform_indices = @transform_10, window_bounds = array<i64: 1, 16, 128>}]} {
    %c0 = arith.constant 0 : index
    %c0_0 = arith.constant 0 : index
    %c0_1 = arith.constant 0 : index
    %0 = vector.load %arg1[%c0, %c0_0, %c0_1] : memref<1x8x128xbf16, #tpu.memory_space<vmem>>, vector<1x8x128xbf16>
    %1 = vector.shape_cast %0 : vector<1x8x128xbf16> to vector<8x128xbf16>
    %c0_2 = arith.constant 0 : index
    %c0_3 = arith.constant 0 : index
    %c0_4 = arith.constant 0 : index
    %2 = vector.load %arg2[%c0_2, %c0_3, %c0_4] : memref<1x1x128xf32, #tpu.memory_space<vmem>>, vector<1x1x128xf32>
    %3 = vector.shape_cast %2 : vector<1x1x128xf32> to vector<1x128xf32>
    %c0_5 = arith.constant 0 : index
    %c0_6 = arith.constant 0 : index
    %4 = vector.load %arg3[%c0_5, %c0_6] : memref<32x8xbf16, #tpu.memory_space<vmem>>, vector<32x8xbf16>
    %cst = arith.constant dense<0.000000e+00> : vector<32x128xf32>
    %5 = tpu.matmul %4, %1, %cst {dimension_numbers = #tpu.dot_dimension_numbers<[1], [0], [0], [1], [0, 0, 1, 1], [], []>} : vector<32x8xbf16>, vector<8x128xbf16>, vector<32x128xf32> -> vector<32x128xf32>
    %c0_7 = arith.constant 0 : index
    %c0_8 = arith.constant 0 : index
    %6 = vector.load %arg4[%c0_7, %c0_8] : memref<32x1xf32, #tpu.memory_space<vmem>>, vector<32x1xf32>
    %7 = vector.broadcast %6 : vector<32x1xf32> to vector<32x128xf32>
    %8 = arith.addf %5, %7 : vector<32x128xf32>
    %cst_9 = arith.constant 0.000000e+00 : f32
    %9 = vector.broadcast %cst_9 : f32 to vector<32x128xf32>
    %10 = arith.maximumf %8, %9 : vector<32x128xf32>
    %11 = arith.truncf %10 : vector<32x128xf32> to vector<32x128xbf16>
    %c0_10 = arith.constant 0 : index
    %c0_11 = arith.constant 0 : index
    %12 = vector.load %arg5[%c0_10, %c0_11] : memref<32x32xbf16, #tpu.memory_space<vmem>>, vector<32x32xbf16>
    %cst_12 = arith.constant dense<0.000000e+00> : vector<32x128xf32>
    %13 = tpu.matmul %12, %11, %cst_12 {dimension_numbers = #tpu.dot_dimension_numbers<[1], [0], [0], [1], [0, 0, 1, 1], [], []>} : vector<32x32xbf16>, vector<32x128xbf16>, vector<32x128xf32> -> vector<32x128xf32>
    %c0_13 = arith.constant 0 : index
    %c0_14 = arith.constant 0 : index
    %14 = vector.load %arg6[%c0_13, %c0_14] : memref<32x1xf32, #tpu.memory_space<vmem>>, vector<32x1xf32>
    %15 = vector.broadcast %14 : vector<32x1xf32> to vector<32x128xf32>
    %16 = arith.addf %13, %15 : vector<32x128xf32>
    %cst_15 = arith.constant 0.000000e+00 : f32
    %17 = vector.broadcast %cst_15 : f32 to vector<32x128xf32>
    %18 = arith.maximumf %16, %17 : vector<32x128xf32>
    %19 = arith.truncf %18 : vector<32x128xf32> to vector<32x128xbf16>
    %c0_16 = arith.constant 0 : index
    %c0_17 = arith.constant 0 : index
    %20 = vector.load %arg7[%c0_16, %c0_17] : memref<32x32xbf16, #tpu.memory_space<vmem>>, vector<32x32xbf16>
    %cst_18 = arith.constant dense<0.000000e+00> : vector<32x128xf32>
    %21 = tpu.matmul %20, %19, %cst_18 {dimension_numbers = #tpu.dot_dimension_numbers<[1], [0], [0], [1], [0, 0, 1, 1], [], []>} : vector<32x32xbf16>, vector<32x128xbf16>, vector<32x128xf32> -> vector<32x128xf32>
    %c0_19 = arith.constant 0 : index
    %c0_20 = arith.constant 0 : index
    %22 = vector.load %arg8[%c0_19, %c0_20] : memref<32x1xf32, #tpu.memory_space<vmem>>, vector<32x1xf32>
    %23 = vector.broadcast %22 : vector<32x1xf32> to vector<32x128xf32>
    %24 = arith.addf %21, %23 : vector<32x128xf32>
    %cst_21 = arith.constant 0.000000e+00 : f32
    %25 = vector.broadcast %cst_21 : f32 to vector<32x128xf32>
    %26 = arith.maximumf %24, %25 : vector<32x128xf32>
    %27 = arith.truncf %26 : vector<32x128xf32> to vector<32x128xbf16>
    %c0_22 = arith.constant 0 : index
    %c0_23 = arith.constant 0 : index
    %28 = vector.load %arg9[%c0_22, %c0_23] : memref<16x32xbf16, #tpu.memory_space<vmem>>, vector<16x32xbf16>
    %cst_24 = arith.constant dense<0.000000e+00> : vector<16x128xf32>
    %29 = tpu.matmul %28, %27, %cst_24 {dimension_numbers = #tpu.dot_dimension_numbers<[1], [0], [0], [1], [0, 0, 1, 1], [], []>} : vector<16x32xbf16>, vector<32x128xbf16>, vector<16x128xf32> -> vector<16x128xf32>
    %c0_25 = arith.constant 0 : index
    %c0_26 = arith.constant 0 : index
    %30 = vector.load %arg10[%c0_25, %c0_26] : memref<16x1xf32, #tpu.memory_space<vmem>>, vector<16x1xf32>
    %31 = vector.broadcast %30 : vector<16x1xf32> to vector<16x128xf32>
    %32 = arith.addf %29, %31 : vector<16x128xf32>
    %cst_27 = arith.constant 0.000000e+00 : f32
    %33 = vector.broadcast %cst_27 : f32 to vector<16x128xf32>
    %34 = arith.maximumf %32, %33 : vector<16x128xf32>
    %cst_28 = arith.constant 0.000000e+00 : f32
    %35 = vector.broadcast %cst_28 : f32 to vector<1x128xf32>
    %36 = arith.cmpf ogt, %3, %35 : vector<1x128xf32>
    %cst_29 = arith.constant -3.000000e+38 : f32
    %37 = vector.shape_cast %36 : vector<1x128xi1> to vector<1x128xi1>
    %38 = vector.broadcast %37 : vector<1x128xi1> to vector<16x128xi1>
    %39 = vector.broadcast %cst_29 : f32 to vector<16x128xf32>
    %40 = arith.select %38, %34, %39 : vector<16x128xi1>, vector<16x128xf32>
    %41 = vector.extract_strided_slice %40 {offsets = [0, 0], sizes = [16, 16], strides = [1, 1]} : vector<16x128xf32> to vector<16x16xf32>
    %42 = vector.extract_strided_slice %40 {offsets = [0, 16], sizes = [16, 16], strides = [1, 1]} : vector<16x128xf32> to vector<16x16xf32>
    %43 = arith.maximumf %41, %42 : vector<16x16xf32>
    %44 = vector.extract_strided_slice %40 {offsets = [0, 32], sizes = [16, 16], strides = [1, 1]} : vector<16x128xf32> to vector<16x16xf32>
    %45 = arith.maximumf %43, %44 : vector<16x16xf32>
    %46 = vector.extract_strided_slice %40 {offsets = [0, 48], sizes = [16, 16], strides = [1, 1]} : vector<16x128xf32> to vector<16x16xf32>
    %47 = arith.maximumf %45, %46 : vector<16x16xf32>
    %48 = vector.extract_strided_slice %40 {offsets = [0, 64], sizes = [16, 16], strides = [1, 1]} : vector<16x128xf32> to vector<16x16xf32>
    %49 = arith.maximumf %47, %48 : vector<16x16xf32>
    %50 = vector.extract_strided_slice %40 {offsets = [0, 80], sizes = [16, 16], strides = [1, 1]} : vector<16x128xf32> to vector<16x16xf32>
    %51 = arith.maximumf %49, %50 : vector<16x16xf32>
    %52 = vector.extract_strided_slice %40 {offsets = [0, 96], sizes = [16, 16], strides = [1, 1]} : vector<16x128xf32> to vector<16x16xf32>
    %53 = arith.maximumf %51, %52 : vector<16x16xf32>
    %54 = vector.extract_strided_slice %40 {offsets = [0, 112], sizes = [16, 16], strides = [1, 1]} : vector<16x128xf32> to vector<16x16xf32>
    %55 = arith.maximumf %53, %54 : vector<16x16xf32>
    %cst_30 = arith.constant 0.000000e+00 : f32
    %56 = vector.broadcast %cst_30 : f32 to vector<16x16xf32>
    %57 = arith.maximumf %55, %56 : vector<16x16xf32>
    %cst_31 = arith.constant 0.000000e+00 : f32
    %58 = vector.broadcast %cst_31 : f32 to vector<16x112xf32>
    %59 = tpu.concatenate %57, %58 in 1 : vector<16x16xf32>, vector<16x112xf32> -> vector<16x128xf32>
    %c0_32 = arith.constant 0 : index
    %c0_33 = arith.constant 0 : index
    %c0_34 = arith.constant 0 : index
    %60 = vector.load %arg11[%c0_32, %c0_33, %c0_34] : memref<1x16x128xf32, #tpu.memory_space<vmem>>, vector<1x16x128xf32>
    %61 = vector.shape_cast %60 : vector<1x16x128xf32> to vector<16x128xf32>
    %62 = vector.shape_cast %59 : vector<16x128xf32> to vector<1x16x128xf32>
    tpu.vector_store %arg11[%c0_32, %c0_33, %c0_34], %62 {strides = array<i32>} : memref<1x16x128xf32, #tpu.memory_space<vmem>>, vector<1x16x128xf32>,
    return
  }
  func.func @transform_0(%arg0: i32) -> (i32, i32, i32) {
    %c0_i32 = arith.constant 0 : i32
    %c0_i32_0 = arith.constant 0 : i32
    %c0_i32_1 = arith.constant 0 : i32
    return %arg0, %c0_i32, %c0_i32_0 : i32, i32, i32
  }
  func.func @transform_1(%arg0: i32) -> (i32, i32, i32) {
    %c0_i32 = arith.constant 0 : i32
    %c0_i32_0 = arith.constant 0 : i32
    %c0_i32_1 = arith.constant 0 : i32
    return %arg0, %c0_i32, %c0_i32_0 : i32, i32, i32
  }
  func.func @transform_2(%arg0: i32) -> (i32, i32) {
    %c0_i32 = arith.constant 0 : i32
    %c0_i32_0 = arith.constant 0 : i32
    %c0_i32_1 = arith.constant 0 : i32
    return %c0_i32, %c0_i32_0 : i32, i32
  }
  func.func @transform_3(%arg0: i32) -> (i32, i32) {
    %c0_i32 = arith.constant 0 : i32
    %c0_i32_0 = arith.constant 0 : i32
    %c0_i32_1 = arith.constant 0 : i32
    return %c0_i32, %c0_i32_0 : i32, i32
  }
  func.func @transform_4(%arg0: i32) -> (i32, i32) {
    %c0_i32 = arith.constant 0 : i32
    %c0_i32_0 = arith.constant 0 : i32
    %c0_i32_1 = arith.constant 0 : i32
    return %c0_i32, %c0_i32_0 : i32, i32
  }
  func.func @transform_5(%arg0: i32) -> (i32, i32) {
    %c0_i32 = arith.constant 0 : i32
    %c0_i32_0 = arith.constant 0 : i32
    %c0_i32_1 = arith.constant 0 : i32
    return %c0_i32, %c0_i32_0 : i32, i32
  }
  func.func @transform_6(%arg0: i32) -> (i32, i32) {
    %c0_i32 = arith.constant 0 : i32
    %c0_i32_0 = arith.constant 0 : i32
    %c0_i32_1 = arith.constant 0 : i32
    return %c0_i32, %c0_i32_0 : i32, i32
  }
  func.func @transform_7(%arg0: i32) -> (i32, i32) {
    %c0_i32 = arith.constant 0 : i32
    %c0_i32_0 = arith.constant 0 : i32
    %c0_i32_1 = arith.constant 0 : i32
    return %c0_i32, %c0_i32_0 : i32, i32
  }
  func.func @transform_8(%arg0: i32) -> (i32, i32) {
    %c0_i32 = arith.constant 0 : i32
    %c0_i32_0 = arith.constant 0 : i32
    %c0_i32_1 = arith.constant 0 : i32
    return %c0_i32, %c0_i32_0 : i32, i32
  }
  func.func @transform_9(%arg0: i32) -> (i32, i32) {
    %c0_i32 = arith.constant 0 : i32
    %c0_i32_0 = arith.constant 0 : i32
    %c0_i32_1 = arith.constant 0 : i32
    return %c0_i32, %c0_i32_0 : i32, i32
  }
  func.func @transform_10(%arg0: i32) -> (i32, i32, i32) {
    %c0_i32 = arith.constant 0 : i32
    %c0_i32_0 = arith.constant 0 : i32
    %c0_i32_1 = arith.constant 0 : i32
    return %arg0, %c0_i32, %c0_i32_0 : i32, i32, i32
  }
}

</mosaic_0001>

<bundles_post_ra>
// kernel: tpu_custom_call.1
= control target key start
LH: loop header
LB: loop body
LE: loop exit
PB: predicated region body
PF: predicated region fallthrough
CT: control target
= control target key end

     0   :  { %15 = vsyncpa [#allocation3], 0  ;;  %s1338_s0 = inlined_call_operand.vmem [shape: bf16[2,8,128], index: 0, kind: input, shape index: {}]   ;;  %s1339_s1 = inlined_call_operand.vmem [shape: f32[2,1,128], index: 1, kind: input, shape index: {}]   ;;  %s1340_s2 = inlined_call_operand.vmem [shape: bf16[32,8], index: 2, kind: input, shape index: {}]   ;;  %s1341_s3 = inlined_call_operand.vmem [shape: f32[32,1], index: 3, kind: input, shape index: {}]   ;;  %s1342_s4 = inlined_call_operand.vmem [shape: bf16[32,32], index: 4, kind: input, shape index: {}]   ;;  %s1343_s5 = inlined_call_operand.vmem [shape: f32[32,1], index: 5, kind: input, shape index: {}]   ;;  %s1344_s6 = inlined_call_operand.vmem [shape: bf16[32,32], index: 6, kind: input, shape index: {}]   ;;  %s1345_s7 = inlined_call_operand.vmem [shape: f32[32,1], index: 7, kind: input, shape index: {}]   ;;  %s1346_s8 = inlined_call_operand.vmem [shape: bf16[16,32], index: 8, kind: input, shape index: {}]   ;;  %s1347_s9 = inlined_call_operand.vmem [shape: f32[16,1], index: 9, kind: input, shape index: {}]   ;;  %s1348_s10 = inlined_call_operand.hbm [shape: f32[2,16,128], index: 10, kind: output, shape index: {}]  }
   0x1   :  { %17 = vsyncpa [#allocation3 + $0x1], 0  ;;  %s1160_s13 = smov 0   ;;  %s1162_s14 = smov 0  }
   0x2   :  { %s1164_s15 = smov 0   ;;  %s1166_s16 = smov 0  }
   0x3 LB: > { %s1181_s17 = sadd.s32 4294967295, %s1090_s16   ;;  %s899_s18 = sadd.s32 4294967294, %s1090_s16   ;;  %s1090_s16 = sphi %s1166_s16, %s1356_s16   ;;  %s1086_s15 = sphi %s1164_s15, %s1355_s15   ;;  %s1082_s14 = sphi %s1162_s14, %s1354_s14   ;;  %s1078_s13 = sphi %s1160_s13, %s1353_s13  }
   0x4   : > { %s1185_s19 = sadd.s32 1, %s1090_s16   ;;  %s250_s20 = sadd.s32 1, %s1086_s15 }
   0x5   : > { %s247_s21 = ssub.s32 %s1090_s16, %s1185_s19  ;;  %p260_p0 = scmp.ne.s32.totalorder %s1086_s15, %s1082_s14 }
   0x6   : > { %p248_p1 = scmp.eq.s32.totalorder %s247_s21, 0  ;;  %p261_p2 = scmp.eq.s32.totalorder %s1181_s17, 1 }
   0x7   : > { %p266_p3 = scmp.ne.s32.totalorder %s1082_s14, %s1078_s13  ;;  %p267_p4 = scmp.eq.s32.totalorder %s899_s18, 1 }
   0x8   : > { %s1196_s22 = scalar_select %p248_p1, %s1086_s15, %s250_s20  }
   0x9   : > { %p1198_p5 = por %p261_p2, %p260_p0  ;;  %p1202_p6 = por %p267_p4, %p266_p3 }
   0xa   : > { %1349 = sst [smem:[#allocation5_spill]] %s1196_s22  ;;  %p902_p7 = scmp.ge.s32.totalorder %s1090_s16, 1 }
   0xb   : > { %p322_p8 = scmp.lt.s32.totalorder %s1090_s16, 3 }
   0xd   : > { %p323_p9 = pnand %p902_p7, %p322_p8 }
   0xe   : > { %p362_p10 = scmp.lt.s32.totalorder (!%p323_p9), %s1181_s17, 1  ;;  %s1096_s29 = smov (!%p323_p9), 96  }
   0xf   : > { %326 = sbr.rel (%p323_p9) target bundleno = 1021 (0x3fd), region = 60  ;;  %s1097_s30 = smov (!%p323_p9), 80  }
  0x10   : > { %s1098_s11 = smov (!%p323_p9), 64   ;;  %s1100_s18 = smov (!%p323_p9), 32  }
  0x11   : > { %s359_s20 = sand.u32 (!%p323_p9), 1, %s1082_s14   ;;  %s924_s26 = sshll.u32 (!%p323_p9), %s1181_s17, 8 }
  0x12   : > { %s903_s22 = sshll.u32 (!%p323_p9), %s359_s20, 4 }
  0x14   : > { %v1023_v0 = vld [vmem:[%s1340_s2] sm:$0xff]   ;;  %vm410_vm0 = vcmask 64512   ;;  %s363_s27 = scalar_select %p362_p10, %s1181_s17, 1  ;;  %v378_v1 = vld [vmem:[%s1341_s3 + $0x10] sm:$0xff]  ;;  %v1092_v2 = vmov 0   ;;  %vm417_vm1 = vcmask 1043456  }
  0x15   : > { %941 = vmatprep.mubr.msk.bf16.mxu0 %vm410_vm0, %v1023_v0  ;;  %1021 = vset.pattern.permute.xlu0 %v1092_v2  ;;  %v376_v3 = vld [vmem:[%s1341_s3] sm:$0xff]  ;;  %v379_v5 = vld [vmem:[%s1341_s3 + $0x18] sm:$0xff]  ;;  %v377_v7 = vld [vmem:[%s1341_s3 + $0x8] sm:$0xff]  ;;  %vm514_vm3 = vcmask 261120   ;;  %v1093_v61 = vmov 0.0   ;;  %vm1094_vm4 = vmmov 0  }
  0x16   : > { %s904_s12 = sshll.u32 %s363_s27, 2  ;;  %s368_s21 = scalar_lea.vmem %s1339_s1, %s363_s27  ;;  %392 = vperm.xlu0 %1021, %v378_v1   ;;  %1022 = vset.pattern.permute.xlu1 %v1092_v2  ;;  %v1024_v9 = vld [vmem:[%s1340_s2 + $0x8] sm:$0xff]   ;;  %v482_v11 = vld [vmem:[%s1343_s5 + $0x10] sm:$0xff]  ;;  %v483_v12 = vld [vmem:[%s1343_s5 + $0x18] sm:$0xff]  ;;  %vm809_vm6 = vcmask 130048  }
  0x17   : > { %s365_s28 = scalar_lea.vmem %s1338_s0, %s904_s12  ;;  %v371_v4 = vld [vmem:[%s368_s21] sm:$0x1]  ;;  %382 = vperm.xlu1 %1022, %v376_v3   ;;  %v481_v14 = vld [vmem:[%s1343_s5 + $0x8] sm:$0xff]  ;;  %v582_v15 = vld [vmem:[%s1345_s7 + $0x10] sm:$0xff]  ;;  %s1099_s27 = smov 48  }
  0x18   : > { %v370_v6 = vld [vmem:[%s365_s28] sm:$0xf]  ;;  %vm740_vm2 = vcmp.gt.f32.partialorder %v371_v4, 0.0  ;;  %v583_v16 = vld [vmem:[%s1345_s7 + $0x18] sm:$0xff]  ;;  %v581_v18 = vld [vmem:[%s1345_s7 + $0x8] sm:$0xff]  ;;  %s1095_s28 = smov 112  }
  0x19   : > { %969 = vmatprep.subr.msk.bf16.mxu0 %vm417_vm1, %v370_v6  ;;  %v419_v8 = vsel %vm417_vm1, %v370_v6, 0  ;;  %v1235_v10 = vsel %vm740_vm2, 1, %v1092_v2  ;;  %v480_v13 = vld [vmem:[%s1343_s5] sm:$0xff]  ;;  %v678_v20 = vld [vmem:[%s1347_s9 + $0x8] sm:$0xff]  ;;  %s1101_s12 = smov 16   ;;  %s361_s21 = scalar_lea.vmem [#allocation2], %s903_s22 }
  0x1a   : > { %940 = vmatpush3.bf16.msra.mxu0 %v419_v8  ;;  %397 = vperm.xlu0 %1021, %v379_v5   ;;  %v580_v17 = vld [vmem:[%s1345_s7] sm:$0xff]  ;;  %v1026_v40 = vld [vmem:[%s1342_s4 + $0x8] sm:$0xff]   ;;  %s828_s25 = sshll.u32 %s361_s21, 4  ;;  %s1102_s17 = smov [#allocation2]   ;;  %s1291_s25 = int_to_ptr.vmem [resolvable:$true] %s828_s25 }
  0x1b   : > { %387 = vperm.xlu1 %1022, %v377_v7   ;;  %v677_v19 = vld [vmem:[%s1347_s9] sm:$0xff]  ;;  %v1028_v60 = vld [vmem:[%s1344_s6 + $0x8] sm:$0xff]  }
  0x1c   : > { %v1025_v21 = vld [vmem:[%s1342_s4] sm:$0xff]  }
  0x1d   : > { %942 = vmatmul.mubr.msk.bf16.vlgmr.msra.gmra.mxu0 %vm410_vm0, %v1024_v9  ;;  %949 = vmatprep.mubr.msk.bf16.mxu1 %vm514_vm3, %v1025_v21  ;;  %v1027_v41 = vld [vmem:[%s1344_s6] sm:$0xff]  }
  0x1e   : > { %496 = vperm.xlu0 %1021, %v482_v11   ;;  %957 = vmatprep.mubr.msk.bf16.mxu0 %vm514_vm3, %v1027_v41 }
  0x1f   : > { %501 = vperm.xlu1 %1022, %v483_v12  }
  0x22   : > { %486 = vperm.xlu0 %1021, %v480_v13  }
  0x23   : > { %491 = vperm.xlu1 %1022, %v481_v14  }
  0x26   : > { %596 = vperm.xlu0 %1021, %v582_v15  }
  0x27   : > { %601 = vperm.xlu1 %1022, %v583_v16  }
  0x2a   : > { %586 = vperm.xlu0 %1021, %v580_v17   ;;  %v1029_v17 = vld [vmem:[%s1346_s8] sm:$0xff]  }
  0x2b   : > { %591 = vperm.xlu1 %1022, %v581_v18   ;;  %v742_v18 = vlaneseq }
  0x2e   : > { %681 = vperm.xlu0 %1021, %v677_v19   ;;  %v743_v19 = vshrl.u32 %v742_v18, 7 }
  0x2f   : > { %686 = vperm.xlu1 %1022, %v678_v20  }
  0x30   : > { %v744_v20 = vsub.s32 0, %v743_v19 }
  0x32   : > { %v745_v21 = vrot.slane %v1235_v10, %v744_v20 }
  0x34   : > { %vm746_vm5 = vcmp.eq.s32.totalorder %v745_v21, 1 }
  0x91   : > { %v393_v22 = vpop.permute.xlu0 %392 }
  0x92   : > { %v383_v23 = vpop.permute.xlu1 %382 }
  0x95   : > { %v398_v27 = vpop.permute.xlu0 %397 }
  0x96   : > { %v388_v31 = vpop.permute.xlu1 %387 }
  0x99   : > { %v497_v42 = vpop.permute.xlu0 %496 }
  0x9a   : > { %v502_v43 = vpop.permute.xlu1 %501 }
  0x9d   : > { %v487_v47 = vpop.permute.xlu0 %486 }
  0x9e   : > { %v492_v51 = vpop.permute.xlu1 %491 }
  0xa1   : > { %v597_v62 = vpop.permute.xlu0 %596 }
  0xa2   : > { %v602_v63 = vpop.permute.xlu1 %601 }
  0xa5   : > { %v587_v4 = vpop.permute.xlu0 %586 }
  0xa6   : > { %v592_v6 = vpop.permute.xlu1 %591 }
  0xdd   : > { %v943_v24 = vpop.f32.mrf.mxu0 }
  0xde   : > { %v464_v26 = vadd.f32 %v943_v24, %v393_v22  ;;  %v682_v22 = vpop.permute.xlu0 %681 }
  0xdf   : > { %v455_v25 = vpop.f32.mrf.mxu0 }
  0xe0   : > { %v456_v29 = vadd.f32 %v455_v25, %v383_v23  ;;  %v472_v33 = vmax.f32 %v464_v26, 0.0 }
  0xe1   : > { %v944_v28 = vpop.f32.mrf.mxu0 }
  0xe2   : > { %v467_v30 = vadd.f32 %v944_v28, %v398_v27  ;;  %v470_v36 = vmax.f32 %v456_v29, 0.0  ;;  %v687_v27 = vpop.permute.xlu1 %686 }
  0xe3   : > { %v458_v32 = vpop.f32.mrf.mxu0 }
  0xe4   : > { %v473_v34 = vmax.f32 %v467_v30, 0.0  ;;  %v459_v35 = vadd.f32 %v458_v32, %v388_v31 }
  0xe6   : > { %v471_v37 = vmax.f32 %v459_v35, 0.0  ;;  %v475_v38 = vpack.c.bf16 %v473_v34, %v472_v33 }
  0xe8   : > { %v474_v39 = vpack.c.bf16 %v471_v37, %v470_v36  ;;  %945 = vmatprep.subr.bf16.mxu1 %v475_v38 }
  0xe9   : > { %946 = vmatpush3.bf16.msra.mxu1 %v475_v38 }
  0xea   : > { %947 = vmatprep.subr.bf16.mxu1 %v474_v39 }
  0xed   : > { %948 = vmatpush3.bf16.msra.mxu1 %v474_v39 }
  0xee   : > { %961 = vmatprep.subr.bf16.mxu1 %v1093_v61 }
  0xf0   : > { %950 = vmatmul.mubr.msk.bf16.vlgmr.msra.gmra.mxu1 %vm514_vm3, %v1026_v40 }
  0xf1   : > { %965 = vmatprep.mubr.msk.bf16.mxu1 %vm1094_vm4, %v1093_v61 }
 0x1b0   : > { %v951_v44 = vpop.f32.mrf.mxu1 }
 0x1b1   : > { %v564_v46 = vadd.f32 %v951_v44, %v497_v42 }
 0x1b2   : > { %v555_v45 = vpop.f32.mrf.mxu1 }
 0x1b3   : > { %v556_v49 = vadd.f32 %v555_v45, %v487_v47  ;;  %v572_v53 = vmax.f32 %v564_v46, 0.0 }
 0x1b4   : > { %v952_v48 = vpop.f32.mrf.mxu1 }
 0x1b5   : > { %v567_v50 = vadd.f32 %v952_v48, %v502_v43  ;;  %v570_v56 = vmax.f32 %v556_v49, 0.0 }
 0x1b6   : > { %v558_v52 = vpop.f32.mrf.mxu1 }
 0x1b7   : > { %v573_v54 = vmax.f32 %v567_v50, 0.0  ;;  %v559_v55 = vadd.f32 %v558_v52, %v492_v51 }
 0x1b9   : > { %v575_v57 = vpack.c.bf16 %v573_v54, %v572_v53  ;;  %v571_v58 = vmax.f32 %v559_v55, 0.0 }
 0x1bb   : > { %v574_v59 = vpack.c.bf16 %v571_v58, %v570_v56  ;;  %953 = vmatprep.subr.bf16.mxu0 %v575_v57 }
 0x1bc   : > { %954 = vmatpush3.bf16.msra.mxu0 %v575_v57 }
 0x1bd   : > { %955 = vmatprep.subr.bf16.mxu0 %v574_v59 }
 0x1c0   : > { %956 = vmatpush3.bf16.msra.mxu0 %v574_v59 }
 0x1c3   : > { %958 = vmatmul.mubr.msk.bf16.vlgmr.msra.gmra.mxu0 %vm514_vm3, %v1028_v60 }
 0x283   : > { %v959_v0 = vpop.f32.mrf.mxu0 }
 0x284   : > { %v663_v2 = vadd.f32 %v959_v0, %v597_v62 }
 0x285   : > { %v654_v1 = vpop.f32.mrf.mxu0 }
 0x286   : > { %v671_v8 = vmax.f32 %v663_v2, 0.0  ;;  %v655_v9 = vadd.f32 %v654_v1, %v587_v4 }
 0x287   : > { %v960_v3 = vpop.f32.mrf.mxu0 }
 0x288   : > { %v666_v5 = vadd.f32 %v960_v3, %v602_v63  ;;  %v669_v15 = vmax.f32 %v655_v9, 0.0 }
 0x289   : > { %v657_v7 = vpop.f32.mrf.mxu0 }
 0x28a   : > { %v672_v11 = vmax.f32 %v666_v5, 0.0  ;;  %v658_v12 = vadd.f32 %v657_v7, %v592_v6 }
 0x28c   : > { %v674_v13 = vpack.c.bf16 %v672_v11, %v671_v8  ;;  %v670_v14 = vmax.f32 %v658_v12, 0.0 }
 0x28e   : > { %962 = vmatpush3.bf16.msra.mxu1 %v674_v13  ;;  %v673_v16 = vpack.c.bf16 %v670_v14, %v669_v15 }
 0x28f   : > { %963 = vmatprep.subr.bf16.mxu1 %v1093_v61 }
 0x292   : > { %964 = vmatpush3.bf16.msra.mxu1 %v673_v16 }
 0x295   : > { %966 = vmatmul.mubr.msk.bf16.vlgmr.msra.gmra.mxu1 %vm514_vm3, %v1029_v17 }
 0x355   : > { %v731_v23 = vpop.f32.mrf.mxu1 }
 0x356   : > { %v732_v24 = vadd.f32 %v731_v23, %v682_v22 }
 0x357   : > { %v967_v25 = vpop.f32.mrf.mxu1 }
 0x358   : > { %v738_v26 = vmax.f32 %v732_v24, 0.0 }
 0x359   : > { %v734_v28 = vpop.f32.mrf.mxu1 }
 0x35a   : > { %v747_v29 = vsel %vm746_vm5, %v738_v26, -3e+38  ;;  %v735_v30 = vadd.f32 %v734_v28, %v687_v27 }
 0x35b   : > { %751 = vrot.lane.b32.xlu0 %v747_v29, %s1095_s28  ;;  %v968_v31 = vpop.f32.mrf.mxu1 }
 0x35c   : > { %v739_v32 = vmax.f32 %v735_v30, 0.0 }
 0x35e   : > { %v748_v33 = vsel %vm746_vm5, %v739_v32, -3e+38 }
 0x35f   : > { %759 = vrot.lane.b32.xlu0 %v747_v29, %s1096_s29  ;;  %753 = vrot.lane.b32.xlu1 %v748_v33, %s1095_s28 }
 0x363   : > { %767 = vrot.lane.b32.xlu0 %v747_v29, %s1097_s30  ;;  %761 = vrot.lane.b32.xlu1 %v748_v33, %s1096_s29 }
 0x367   : > { %775 = vrot.lane.b32.xlu0 %v747_v29, %s1098_s11  ;;  %769 = vrot.lane.b32.xlu1 %v748_v33, %s1097_s30  ;;  %s1296_s30 = scalar_lea.hbm %s1348_s10, %s924_s26 }
 0x36b   : > { %783 = vrot.lane.b32.xlu0 %v747_v29, %s1099_s27  ;;  %777 = vrot.lane.b32.xlu1 %v748_v33, %s1098_s11  ;;  %s1298_s11 = scalar_lea.sflag [#allocation3], %s359_s20 }
 0x36f   : > { %791 = vrot.lane.b32.xlu0 %v747_v29, %s1100_s18  ;;  %785 = vrot.lane.b32.xlu1 %v748_v33, %s1099_s27  ;;  %s1030_s27 = scalar_lea.vmem %s1291_s25, 256 }
 0x370   : > { %p1031_p11 = scmp.ne.s32.totalorder %s1291_s25, %s1030_s27 }
 0x372   : > { %p1032_p12 = pnand %p1031_p11, %p1198_p5 }
 0x373   : > { %799 = vrot.lane.b32.xlu0 %v747_v29, %s1101_s12  ;;  %793 = vrot.lane.b32.xlu1 %v748_v33, %s1100_s18  ;;  %s1034_s18 = sshll.u32 %s1102_s17, 4  ;;  %s1035_s18 = int_to_ptr.vmem [resolvable:$false] %s1034_s18 }
 0x374   : > { %p1033_p13 = pneg %p1032_p12  ;;  %p1037_p0 = scmp.lt.s32.totalorder %s1291_s25, %s1035_s18 }
 0x377   : > { %801 = vrot.lane.b32.xlu1 %v748_v33, %s1101_s12  ;;  %s1036_s12 = scalar_lea.vmem %s1035_s18, 512 }
 0x378   : > { %p1038_p1 = scmp.lt.s32.totalorder %s1036_s12, %s1030_s27 }
 0x37a   : > { %p1039_p2 = por %p1038_p1, %p1037_p0 }
 0x37c   : > { %p1040_p3 = pnand %p1039_p2, %p1033_p13 }
 0x3cd   : > { %v752_v10 = vpop.permute.xlu0 %751 }
 0x3ce   : > { %v757_v40 = vmax.f32 %v747_v29, %v752_v10 }
 0x3d1   : > { %v760_v34 = vpop.permute.xlu0 %759  ;;  %v754_v35 = vpop.permute.xlu1 %753 }
 0x3d2   : > { %v765_v41 = vmax.f32 %v757_v40, %v760_v34  ;;  %v758_v44 = vmax.f32 %v748_v33, %v754_v35 }
 0x3d5   : > { %v768_v36 = vpop.permute.xlu0 %767  ;;  %v762_v37 = vpop.permute.xlu1 %761 }
 0x3d6   : > { %v773_v45 = vmax.f32 %v765_v41, %v768_v36  ;;  %v766_v46 = vmax.f32 %v758_v44, %v762_v37 }
 0x3d9   : > { %v776_v38 = vpop.permute.xlu0 %775  ;;  %v770_v39 = vpop.permute.xlu1 %769 }
 0x3da   : > { %v781_v47 = vmax.f32 %v773_v45, %v776_v38  ;;  %v774_v50 = vmax.f32 %v766_v46, %v770_v39 }
 0x3dd   : > { %v784_v42 = vpop.permute.xlu0 %783  ;;  %v778_v43 = vpop.permute.xlu1 %777 }
 0x3de   : > { %v789_v51 = vmax.f32 %v781_v47, %v784_v42  ;;  %v782_v52 = vmax.f32 %v774_v50, %v778_v43 }
 0x3e1   : > { %v792_v48 = vpop.permute.xlu0 %791  ;;  %v786_v49 = vpop.permute.xlu1 %785 }
 0x3e2   : > { %v797_v53 = vmax.f32 %v789_v51, %v792_v48  ;;  %v790_v56 = vmax.f32 %v782_v52, %v786_v49 }
 0x3e5   : > { %v800_v54 = vpop.permute.xlu0 %799  ;;  %v794_v55 = vpop.permute.xlu1 %793 }
 0x3e6   : > { %v805_v57 = vmax.f32 %v797_v53, %v800_v54  ;;  %v798_v59 = vmax.f32 %v790_v56, %v794_v55 }
 0x3e8   : > { %v807_v58 = vmax.f32 %v805_v57, 0.0 }
 0x3e9   : > { %v802_v60 = vpop.permute.xlu1 %801 }
 0x3ea   : > { %v810_v61 = vsel %vm809_vm6, %v807_v58, 0.0  ;;  %v806_v62 = vmax.f32 %v798_v59, %v802_v60 }
 0x3eb   : > { %812 = vst [vmem:[%s361_s21] sm:$0xff] %v810_v61 }
 0x3ec   : > { %v808_v63 = vmax.f32 %v806_v62, 0.0 }
 0x3ee   : > { %v811_v0 = vsel %vm809_vm6, %v808_v63, 0.0 }
 0x3ef   : > { %813 = vst [vmem:[%s361_s21 + $0x8] sm:$0xff] %v811_v0 }
 0x3f0   : > { %1043 = shalt.err (!%p1040_p3)
}
 0x3f1   : > { %s1044_s20 = scalar_lea.hbm %s1296_s30, 256  ;;  %s1048_s26 = scalar_lea.hbm %s1348_s10, 512 }
 0x3f2   : > { %p1045_p4 = scmp.ne.s32.totalorder %s1296_s30, %s1044_s20  ;;  %p1049_p9 = scmp.lt.s32.totalorder %s1296_s30, %s1348_s10 }
 0x3f3   : > { %p1050_p10 = scmp.lt.s32.totalorder %s1048_s26, %s1044_s20 }
 0x3f4   : > { %p1046_p7 = pnand %p1045_p4, %p1198_p5 }
 0x3f5   : > { %p1051_p11 = por %p1050_p10, %p1049_p9 }
 0x3f6   : > { %p1047_p8 = pneg %p1046_p7 }
 0x3f8   : > { %p1052_p12 = pnand %p1051_p11, %p1047_p8 }
 0x3fa   : > { %1055 = shalt.err (!%p1052_p12)
}
 0x3fb   : > { %s1103_s27 = smov 128   ;;  %s1104_s17 = smov 8  }
 0x3fc   : > { %970 = dma.vmem_to_hbm [thread:$0]  (%p1198_p5), %s1291_s25, 256, %s1296_s30, %s1298_s11, %s1103_s27, %s1103_s27, %s1104_s17  }
 0x3fd PF: > { %p976_p13 = scmp.ge.s32.totalorder %s1090_s16, 2  ;;  %s843_s18 = sand.u32 1, %s1078_s13  }
 0x3fe   : > { %s844_s12 = scalar_lea.sflag [#allocation3], %s843_s18 }
 0x3ff   : > { %p973_p0 = pnand %p976_p13, %p1202_p6 }
 0x401   : > { %p974_p1 = pneg %p973_p0 }
 0x403   : > { %1073 = dma.done.wait (%p974_p1), %s844_s12, 256  }
 0x404   : > { %1075 = vsyncadd (%p974_p1), %s844_s12, 4294967040  ;;  %s1352_s20 = sld [smem:[#allocation5_spill]]  ;;  %p20_p2 = scmp.ge.s32.totalorder %s1185_s19, 4  }
 0x405   : > { %s1353_s13 = smov %s1082_s14  ;;  %s1354_s14 = smov %s1086_s15 }
 0x406   : > { %s1356_s16 = smov %s1185_s19  ;;  %22 = sbr.rel (!%p20_p2) target bundleno = 3 (0x3), region = 98 }
 0x40a   : > { %s1355_s15 = smov %s1352_s20 }
 0x40b   :  { %849 = vsyncpa [#allocation3], 1 }
 0x40c   :  { %851 = vsyncpa [#allocation3 + $0x1], 1 }

</bundles_post_ra>
